<compile_context>
chip_gen: v7x
topology: tpu7x:2x2x1
jax: 0.10.0
libtpu: 0.0.40
codegen_flags: <defaults>
</compile_context>

<pallas_src>
import functools

import jax
import jax.numpy as jnp
from jax.experimental import pallas as pl
from jax.experimental.pallas import tpu as pltpu


def _round_up(x, m):
    return (x + m - 1) // m * m


def _round_down(x, m):
    return (x // m) * m


def _band_matrix(weight, n_rows, n_cols, reduction, dtype):
    """S[p*R + r, p] = weight[r]; zero elsewhere (incl. tail rows >= n_cols*R)."""
    rows = jnp.arange(n_rows)
    cols = jnp.arange(n_cols)
    hit = (rows[:, None] // reduction == cols[None, :]) & (
        rows[:, None] < n_cols * reduction)
    vals = weight.astype(dtype)[rows % reduction]
    return jnp.where(hit, vals[:, None], jnp.zeros((), dtype)).astype(dtype)


def _conv_subsample_kernel(x_ref, s_ref, b_ref, o_ref):
    # (TM, Kb) @ (Kb, TN) on the MXU, full f32 accumulation, scalar bias from SMEM.
    acc = jnp.dot(x_ref[...], s_ref[...],
                  preferred_element_type=jnp.float32,
                  precision=jax.lax.Precision.HIGHEST)
    o_ref[...] = (acc + b_ref[0, 0]).astype(o_ref.dtype)


@functools.partial(jax.jit, static_argnames=("reduction", "vmem_tile_budget_bytes"))
def conv_subsample(x, weight, bias, *, reduction,
                   vmem_tile_budget_bytes=20 * 1024 * 1024):
    """Pallas forward of ConvSubSample.

    x:      (B, F, W)  input (batch, features, windows)
    weight: (R,)       Conv2d(1, 1, (1, R), stride=(1, R)) kernel taps
    bias:   ()         Conv2d bias (single output channel)
    returns (B, F, Wo) with Wo = (W - R)//R + 1
    """
    B, F, W = x.shape
    R = int(reduction)
    if W < R:
        raise ValueError(f"window dim {W} must be >= reduction {R}")
    Wo = (W - R) // R + 1
    M = B * F
    xm = x.reshape(M, W)                 # free reshape, no copy

    # ---- output-column tiling --------------------------------------------------
    # Band path: one resident (TN*R, TN) weight tile reused for every column tile,
    # x streamed in fully in-bounds (TM, TN*R) slices.  Requires TN | Wo and
    # TN % 128 == 0.  Otherwise (small Wo) a single dense tile is already optimal.
    tn = None
    if Wo > 512:
        for cand in (512, 256, 128):     # 256+ matches the v6e/v7x 256-wide MXU
            if Wo % cand == 0:
                tn = cand
                break
    # TODO(synk): large Wo not divisible by 128 falls back to the dense single-tile
    # path (correct, but keeps the full (W, Wo) S resident and redoes MXU work).

    if tn is not None:
        x_block_w, s_rows, s_cols, o_block_w = tn * R, tn * R, tn, tn
        grid_n = Wo // tn
        x_imap = lambda i, j: (i, j)
        o_imap = lambda i, j: (i, j)
    else:
        x_block_w, s_rows, s_cols, o_block_w = W, W, Wo, Wo
        grid_n = 1
        x_imap = lambda i, j: (i, 0)
        o_imap = lambda i, j: (i, 0)

    s_mat = _band_matrix(weight, s_rows, s_cols, R, x.dtype)
    bias_arr = jnp.asarray(bias, jnp.float32).reshape(1, 1)

    # ---- row tile TM from a VMEM budget ----------------------------------------
    itemsize = jnp.dtype(x.dtype).itemsize
    s_bytes = s_rows * s_cols * itemsize
    per_row = 2 * (x_block_w + o_block_w) * itemsize     # double-buffered in + out
    tm = max(8, (vmem_tile_budget_bytes - s_bytes) // per_row)
    tm = min(tm, 4096)
    if tm >= M:
        tm = M
        # Keep >= 2 row tiles on large inputs so both v7x TensorCores stay busy.
        if M >= 1024 and grid_n == 1:
            tm = _round_up(pl.cdiv(M, 2), 8)
    else:
        tm = _round_down(tm, 256) if tm >= 512 else _round_down(tm, 8)
    grid_m = pl.cdiv(M, tm)              # ragged last tile handled by Pallas masking

    cost = pl.CostEstimate(
        flops=2 * M * Wo * s_rows,
        transcendentals=0,
        bytes_accessed=itemsize * (M * W + M * Wo) + s_bytes,
    )

    out = pl.pallas_call(
        _conv_subsample_kernel,
        out_shape=jax.ShapeDtypeStruct((M, Wo), x.dtype),
        grid_spec=pl.GridSpec(
            grid=(grid_m, grid_n),
            in_specs=[
                pl.BlockSpec((tm, x_block_w), x_imap),               # x row/col tile
                pl.BlockSpec((s_rows, s_cols), lambda i, j: (0, 0)),  # resident band
                pl.BlockSpec(memory_space=pltpu.MemorySpace.SMEM),    # (1,1) bias
            ],
            out_specs=pl.BlockSpec((tm, o_block_w), o_imap),
        ),
        compiler_params=pltpu.CompilerParams(
            dimension_semantics=("parallel", "parallel"),
            vmem_limit_bytes=32 * 1024 * 1024,
        ),
        cost_estimate=cost,
    )(xm, s_mat, bias_arr)

    return out.reshape(B, F, Wo)


def _reference(x, w, b, R):
    B, F, W = x.shape
    Wo = (W - R) // R + 1
    return jnp.einsum("bftr,r->bft", x[..., :Wo * R].reshape(B, F, Wo, R), w) + b


if __name__ == "__main__":
    key = jax.random.PRNGKey(0)
    k_x, k_w, k_b, k_x2, k_w2 = jax.random.split(key, 5)

    # --- small config (dense single-tile path), matches the module's typical use ---
    B, F, W, R = 2, 32, 16, 2
    x = jax.random.normal(k_x, (B, F, W), jnp.float32)
    s = 1.0 / (R ** 0.5)                 # Conv2d default init bound, fan_in = R
    w = jax.random.uniform(k_w, (R,), jnp.float32, -s, s)
    b = jax.random.uniform(k_b, (), jnp.float32, -s, s)

    out = conv_subsample(x, w, b, reduction=R)
    jax.block_until_ready(out)

    Wo = (W - R) // R + 1
    ref = _reference(x, w, b, R)
    assert out.shape == (B, F, Wo), f"bad output shape {out.shape}"
    assert jnp.allclose(out, ref, atol=1e-2, rtol=1e-2), "output mismatch (dense path)"

    # --- longer-window config exercising the banded-tiling path (Wo > 512) ---------
    B2, F2, W2, R2 = 2, 8, 2305, 3       # Wo = 768 -> TN = 256 band tiles, tail dropped
    x2 = jax.random.normal(k_x2, (B2, F2, W2), jnp.float32)
    s2 = 1.0 / (R2 ** 0.5)
    w2 = jax.random.uniform(k_w2, (R2,), jnp.float32, -s2, s2)

    out2 = conv_subsample(x2, w2, b, reduction=R2)
    jax.block_until_ready(out2)

    Wo2 = (W2 - R2) // R2 + 1
    ref2 = _reference(x2, w2, b, R2)
    assert out2.shape == (B2, F2, Wo2), f"bad output shape {out2.shape}"
    assert jnp.allclose(out2, ref2, atol=1e-2, rtol=1e-2), "output mismatch (band path)"

    print("KERNEL_OK")
</pallas_src>

<mosaic_0001>
module attributes {stable_mosaic.version = 11 : i64} {
  func.func @_conv_subsample_kernel(%arg0: i32, %arg1: i32, %arg2: memref<64x16xf32, #tpu.memory_space<vmem>>, %arg3: memref<16x8xf32, #tpu.memory_space<vmem>>, %arg4: memref<1x1xf32, #tpu.memory_space<smem>>, %arg5: memref<64x8xf32, #tpu.memory_space<vmem>>) attributes {dimension_semantics = [#tpu.dimension_semantics<parallel>, #tpu.dimension_semantics<parallel>], iteration_bounds = array<i64: 1, 1>, scalar_prefetch = 0 : i64, scratch_operands = 0 : i64, tpu.core_type = #tpu.core_type<tc>, window_params = [{transform_indices = @transform_0, window_bounds = array<i64: 64, 16>}, {pipeline_mode = #tpu.pipeline_mode<synchronous>, transform_indices = @transform_1, window_bounds = array<i64: 16, 8>}, {transform_indices = @transform_2, window_bounds = array<i64: 1, 1>}, {transform_indices = @transform_3, window_bounds = array<i64: 64, 8>}]} {
    %c0 = arith.constant 0 : index
    %c0_0 = arith.constant 0 : index
    %0 = vector.load %arg2[%c0, %c0_0] : memref<64x16xf32, #tpu.memory_space<vmem>>, vector<64x16xf32>
    %c0_1 = arith.constant 0 : index
    %c0_2 = arith.constant 0 : index
    %1 = vector.load %arg3[%c0_1, %c0_2] : memref<16x8xf32, #tpu.memory_space<vmem>>, vector<16x8xf32>
    %cst = arith.constant dense<0.000000e+00> : vector<64x8xf32>
    %2 = tpu.matmul %0, %1, %cst {dimension_numbers = #tpu.dot_dimension_numbers<[1], [0], [0], [1], [0, 0, 1, 1], [], []>, precision = #tpu.contract_precision<fp32>} : vector<64x16xf32>, vector<16x8xf32>, vector<64x8xf32> -> vector<64x8xf32>
    %c0_3 = arith.constant 0 : index
    %c0_4 = arith.constant 0 : index
    %3 = memref.load %arg4[%c0_3, %c0_4] : memref<1x1xf32, #tpu.memory_space<smem>>
    %4 = vector.broadcast %3 : f32 to vector<64x8xf32>
    %5 = arith.addf %2, %4 : vector<64x8xf32>
    %c0_5 = arith.constant 0 : index
    %c0_6 = arith.constant 0 : index
    %6 = vector.load %arg5[%c0_5, %c0_6] : memref<64x8xf32, #tpu.memory_space<vmem>>, vector<64x8xf32>
    tpu.vector_store %arg5[%c0_5, %c0_6], %5 {strides = array<i32>} : memref<64x8xf32, #tpu.memory_space<vmem>>, vector<64x8xf32>,
    return
  }
  func.func @transform_0(%arg0: i32, %arg1: i32) -> (i32, i32) {
    %c0_i32 = arith.constant 0 : i32
    %c0_i32_0 = arith.constant 0 : i32
    return %arg0, %c0_i32 : i32, i32
  }
  func.func @transform_1(%arg0: i32, %arg1: i32) -> (i32, i32) {
    %c0_i32 = arith.constant 0 : i32
    %c0_i32_0 = arith.constant 0 : i32
    %c0_i32_1 = arith.constant 0 : i32
    return %c0_i32, %c0_i32_0 : i32, i32
  }
  func.func @transform_2(%arg0: i32, %arg1: i32) -> (i32, i32) {
    %c0_i32 = arith.constant 0 : i32
    %c0_i32_0 = arith.constant 0 : i32
    %c0_i32_1 = arith.constant 0 : i32
    return %c0_i32, %c0_i32_0 : i32, i32
  }
  func.func @transform_3(%arg0: i32, %arg1: i32) -> (i32, i32) {
    %c0_i32 = arith.constant 0 : i32
    %c0_i32_0 = arith.constant 0 : i32
    return %arg0, %c0_i32 : i32, i32
  }
}

</mosaic_0001>

<bundles_post_ra>
// kernel: conv_subsample.1
= control target key start
LH: loop header
LB: loop body
LE: loop exit
PB: predicated region body
PF: predicated region fallthrough
CT: control target
= control target key end

     0   :  { %vm27_vm0 = vcmask 130048   ;;  %vm812_vm1 = vcmask 64512   ;;  %s1220_s1 = inlined_call_operand.vmem [shape: f32[16,8], index: 1, kind: input, shape index: {}]   ;;  %s1221_s0 = inlined_call_operand.vmem [shape: f32[64,16], index: 0, kind: input, shape index: {}]   ;;  %s1222_s2 = inlined_call_operand.<no memory space> [shape: f32[1,1], index: 2, kind: input, shape index: {}]   ;;  %s1223_s3 = inlined_call_operand.vmem [shape: f32[64,8], index: 3, kind: output, shape index: {}]  }
   0x1   :  { %v23_v0 = vld [vmem:[%s1220_s1] sm:$0xff]  ;;  %v24_v1 = vld [vmem:[%s1220_s1 + $0x8] sm:$0xff]  ;;  %v17_v7 = vld [vmem:[%s1221_s0 + $0x10] sm:$0xff] }
   0x2   :  { %v15_v2 = vld [vmem:[%s1221_s0] sm:$0xff]  ;;  %v53_v3 = vand.u32 4294901760, %v23_v0  ;;  %v56_v4 = vand.u32 4294901760, %v24_v1  ;;  %v16_v6 = vld [vmem:[%s1221_s0 + $0x8] sm:$0xff]  ;;  %v18_v8 = vld [vmem:[%s1221_s0 + $0x18] sm:$0xff]  ;;  %v35_v11 = vsel %vm27_vm0, %v17_v7, 0 }
   0x3   :  { %v29_v5 = vsel %vm27_vm0, %v15_v2, 0  ;;  %v32_v10 = vsel %vm27_vm0, %v16_v6, 0  ;;  %v38_v12 = vsel %vm27_vm0, %v18_v8, 0  ;;  %v19_v13 = vld [vmem:[%s1221_s0 + $0x20] sm:$0xff]  ;;  %v1104_v16 = vand.u32 4294901760, %v35_v11  ;;  %v20_v18 = vld [vmem:[%s1221_s0 + $0x28] sm:$0xff] }
   0x4   :  { %v1092_v9 = vand.u32 4294901760, %v29_v5  ;;  %v1100_v14 = vpack.c.bf16 %v56_v4, %v53_v3  ;;  %v1102_v15 = vand.u32 4294901760, %v32_v10  ;;  %v201_v17 = vsub.f32 %v23_v0, %v53_v3  ;;  %v21_v39 = vld [vmem:[%s1221_s0 + $0x30] sm:$0xff]  ;;  %v22_v48 = vld [vmem:[%s1221_s0 + $0x38] sm:$0xff] }
   0x5   :  { %v208_v20 = vsub.f32 %v24_v1, %v56_v4  ;;  %v1112_v21 = vand.u32 4294901760, %v38_v12  ;;  %v41_v22 = vsel %vm27_vm0, %v19_v13, 0  ;;  %v1121_v24 = vsub.f32 %v35_v11, %v1104_v16 }
   0x6   :  { %v1110_v19 = vsub.f32 %v29_v5, %v1092_v9  ;;  %994 = vmatprep.subr.bf16.mxu0 %v1100_v14  ;;  %982 = vmatprep.subr.bf16.mxu1 %v1100_v14  ;;  %v1118_v23 = vsub.f32 %v32_v10, %v1102_v15  ;;  %v202_v25 = vand.u32 4294901760, %v201_v17  ;;  %v1123_v26 = vand.u32 4294901760, %v41_v22 }
   0x7   :  { %996 = vmatpush3.bf16.msra.mxu0 %v1100_v14  ;;  %984 = vmatpush3.bf16.msra.mxu1 %v1100_v14  ;;  %v209_v28 = vand.u32 4294901760, %v208_v20  ;;  %v1129_v29 = vsub.f32 %v38_v12, %v1112_v21  ;;  %v44_v30 = vsel %vm27_vm0, %v20_v18, 0  ;;  %v141_v32 = vand.u32 4294901760, %v1121_v24 }
   0x8   :  { %v121_v27 = vand.u32 4294901760, %v1110_v19  ;;  %v131_v31 = vand.u32 4294901760, %v1118_v23  ;;  %v203_v33 = vsub.f32 %v201_v17, %v202_v25  ;;  %v1135_v34 = vsub.f32 %v41_v22, %v1123_v26 }
   0x9   :  { %v210_v36 = vsub.f32 %v208_v20, %v209_v28  ;;  %v151_v37 = vand.u32 4294901760, %v1129_v29  ;;  %v997_v38 = vpack.c.bf16 %v209_v28, %v202_v25  ;;  %v142_v42 = vsub.f32 %v1121_v24, %v141_v32 }
   0xa   :  { %937 = vmatprep.mubr.f32.mxu0 %v121_v27  ;;  %v122_v35 = vsub.f32 %v1110_v19, %v121_v27  ;;  %v132_v40 = vsub.f32 %v1118_v23, %v131_v31  ;;  %v204_v41 = vand.u32 4294901760, %v203_v33  ;;  %v161_v43 = vand.u32 4294901760, %v1135_v34 }
   0xb   :  { %938 = vmatmul.mubr.f32.vlgmr.msra.gmra.mrb[0].mxu0 %v131_v31  ;;  %v211_v45 = vand.u32 4294901760, %v210_v36  ;;  %998 = vmatprep.subr.bf16.mxu0 %v997_v38  ;;  %v152_v46 = vsub.f32 %v1129_v29, %v151_v37  ;;  %v1146_v47 = vand.u32 4294901760, %v44_v30  ;;  %v143_v50 = vand.u32 4294901760, %v142_v42 }
   0xc   :  { %v123_v44 = vand.u32 4294901760, %v122_v35  ;;  %940 = vmatprep.mubr.f32.mxu0 %v141_v32  ;;  %v133_v49 = vand.u32 4294901760, %v132_v40  ;;  %1000 = vmatpush3.bf16.msra.mxu0 %v997_v38  ;;  %v162_v51 = vsub.f32 %v1135_v34, %v161_v43  ;;  %v47_v52 = vsel %vm27_vm0, %v21_v39, 0 }
   0xd   :  { %v985_v53 = vpack.c.bf16 %v211_v45, %v204_v41  ;;  %v1154_v54 = vsub.f32 %v44_v30, %v1146_v47  ;;  %v179_v55 = vand.u32 4294901760, %v47_v52  ;;  %1002 = vmatprep.subr.bf16.mxu0 %v1100_v14  ;;  %v153_v56 = vand.u32 4294901760, %v152_v46 }
   0xe   :  { %889 = vmatprep.mubr.f32.mxu1 %v123_v44  ;;  %v50_v57 = vsel %vm27_vm0, %v22_v48, 0  ;;  %v989_v58 = vpack.c.bf16 %v208_v20, %v201_v17  ;;  %v163_v60 = vand.u32 4294901760, %v162_v51  ;;  %v26_v10 = vstv %s1222_s2 }
   0xf   :  { %890 = vmatmul.mubr.f32.vlgmr.msra.gmra.mrb[0].mxu1 %v133_v49  ;;  %941 = vmatmul.mubr.f32.gmra.mrb[2].mxu0 %v151_v37  ;;  %v171_v59 = vand.u32 4294901760, %v1154_v54  ;;  %v180_v61 = vsub.f32 %v47_v52, %v179_v55  ;;  %v189_v62 = vand.u32 4294901760, %v50_v57 }
  0x10   :  { %986 = vmatprep.subr.bf16.mxu1 %v985_v53  ;;  %892 = vmatprep.mubr.f32.mxu1 %v143_v50 }
  0x11   :  { %988 = vmatpush3.bf16.msra.mxu1 %v985_v53  ;;  %943 = vmatprep.mubr.f32.mxu0 %v161_v43  ;;  %v181_v63 = vand.u32 4294901760, %v180_v61  ;;  %v172_v0 = vsub.f32 %v1154_v54, %v171_v59  ;;  %v190_v1 = vsub.f32 %v50_v57, %v189_v62 }
  0x12   :  { %990 = vmatprep.subr.bf16.mxu1 %v989_v58 }
  0x13   :  { %893 = vmatmul.mubr.f32.gmra.mrb[2].mxu1 %v153_v56  ;;  %944 = vmatmul.mubr.f32.gmra.mrb[4].mxu0 %v171_v59  ;;  %v173_v2 = vand.u32 4294901760, %v172_v0  ;;  %v191_v3 = vand.u32 4294901760, %v190_v1  ;;  %v182_v4 = vsub.f32 %v180_v61, %v181_v63 }
  0x14   :  { %895 = vmatprep.mubr.f32.mxu1 %v163_v60  ;;  %946 = vmatprep.mubr.f32.mxu0 %v181_v63 }
  0x15   :  { %v183_v5 = vand.u32 4294901760, %v182_v4  ;;  %v192_v6 = vsub.f32 %v190_v1, %v191_v3 }
  0x17   :  { %896 = vmatmul.mubr.f32.gmra.mrb[4].mxu1 %v173_v2  ;;  %947 = vmatmul.mubr.f32.gmra.mrb[6].mxu0 %v191_v3  ;;  %v193_v7 = vand.u32 4294901760, %v192_v6 }
  0x18   :  { %898 = vmatprep.mubr.f32.mxu1 %v183_v5  ;;  %953 = vmatprep.mubr.f32.mxu0 %v1092_v9 }
  0x1b   :  { %899 = vmatmul.mubr.f32.gmra.mrb[6].mxu1 %v193_v7  ;;  %954 = vmatmul.mubr.f32.vlgmr.msra.gmra.mrb[0].mxu0 %v1102_v15 }
  0x1c   :  { %905 = vmatprep.mubr.f32.mxu1 %v1092_v9  ;;  %956 = vmatprep.mubr.f32.mxu0 %v1104_v16 }
  0x1d   :  { %1004 = vmatpush3.bf16.msra.mxu0 %v1100_v14 }
  0x1f   :  { %906 = vmatmul.mubr.f32.vlgmr.msra.gmra.mrb[0].mxu1 %v1102_v15  ;;  %957 = vmatmul.mubr.f32.gmra.mrb[2].mxu0 %v1112_v21 }
  0x20   :  { %992 = vmatpush3.bf16.msra.mxu1 %v989_v58  ;;  %908 = vmatprep.mubr.f32.mxu1 %v1104_v16 }
  0x21   :  { %959 = vmatprep.mubr.f32.mxu0 %v1123_v26 }
  0x23   :  { %909 = vmatmul.mubr.f32.gmra.mrb[2].mxu1 %v1112_v21  ;;  %960 = vmatmul.mubr.f32.gmra.mrb[4].mxu0 %v1146_v47 }
  0x24   :  { %911 = vmatprep.mubr.f32.mxu1 %v1123_v26  ;;  %962 = vmatprep.mubr.f32.mxu0 %v179_v55 }
  0x27   :  { %912 = vmatmul.mubr.f32.gmra.mrb[4].mxu1 %v1146_v47  ;;  %963 = vmatmul.mubr.f32.gmra.mrb[6].mxu0 %v189_v62 }
  0x28   :  { %914 = vmatprep.mubr.f32.mxu1 %v179_v55  ;;  %969 = vmatprep.mubr.f32.mxu0 %v1092_v9 }
  0x2b   :  { %915 = vmatmul.mubr.f32.gmra.mrb[6].mxu1 %v189_v62  ;;  %970 = vmatmul.mubr.f32.vlgmr.msra.gmra.mrb[0].mxu0 %v1102_v15 }
  0x2c   :  { %921 = vmatprep.mubr.f32.mxu1 %v1110_v19  ;;  %972 = vmatprep.mubr.f32.mxu0 %v1104_v16 }
  0x2f   :  { %922 = vmatmul.mubr.f32.vlgmr.msra.gmra.mrb[0].mxu1 %v1118_v23  ;;  %973 = vmatmul.mubr.f32.gmra.mrb[2].mxu0 %v1112_v21 }
  0x30   :  { %924 = vmatprep.mubr.f32.mxu1 %v1121_v24  ;;  %975 = vmatprep.mubr.f32.mxu0 %v1123_v26 }
  0x33   :  { %925 = vmatmul.mubr.f32.gmra.mrb[2].mxu1 %v1129_v29  ;;  %976 = vmatmul.mubr.f32.gmra.mrb[4].mxu0 %v1146_v47 }
  0x34   :  { %927 = vmatprep.mubr.f32.mxu1 %v1135_v34  ;;  %978 = vmatprep.mubr.f32.mxu0 %v179_v55 }
  0x37   :  { %928 = vmatmul.mubr.f32.gmra.mrb[4].mxu1 %v1154_v54  ;;  %979 = vmatmul.mubr.f32.gmra.mrb[6].mxu0 %v189_v62 }
  0x38   :  { %930 = vmatprep.mubr.f32.mxu1 %v180_v61 }
  0x3b   :  { %931 = vmatmul.mubr.f32.gmra.mrb[6].mxu1 %v190_v1 }
  0xfe   :  { %v971_v8 = vpop.f32.mrb[0].mxu0 }
  0xff   :  { %v766_v9 = vpop.f32.mrb[1].mxu0 }
 0x102   :  { %v923_v11 = vpop.f32.mrb[0].mxu1  ;;  %v974_v12 = vpop.f32.mrb[2].mxu0 }
 0x103   :  { %v1005_v13 = vadd.f32 %v923_v11, %v26_v10  ;;  %v394_v14 = vpop.f32.mrb[1].mxu1  ;;  %v778_v15 = vpop.f32.mrb[3].mxu0 }
 0x104   :  { %v1007_v16 = vadd.f32 %v394_v14, %v26_v10 }
 0x105   :  { %v1006_v17 = vadd.f32 %v1005_v13, %v971_v8 }
 0x106   :  { %v1008_v18 = vadd.f32 %v1007_v16, %v766_v9  ;;  %v926_v19 = vpop.f32.mrb[2].mxu1  ;;  %v977_v20 = vpop.f32.mrb[4].mxu0 }
 0x107   :  { %814 = vst.msk [vmem:[%s1223_s3 + $0x8] sm:$0xff] %vm812_vm1, %v1006_v17  ;;  %v1009_v21 = vadd.f32 %v926_v19, %v26_v10  ;;  %v408_v22 = vpop.f32.mrb[3].mxu1  ;;  %v790_v23 = vpop.f32.mrb[5].mxu0 }
 0x108   :  { %813 = vst.msk [vmem:[%s1223_s3] sm:$0xff] %vm812_vm1, %v1008_v18  ;;  %v1011_v24 = vadd.f32 %v408_v22, %v26_v10 }
 0x109   :  { %v1010_v25 = vadd.f32 %v1009_v21, %v974_v12 }
 0x10a   :  { %v1012_v26 = vadd.f32 %v1011_v24, %v778_v15  ;;  %v929_v27 = vpop.f32.mrb[4].mxu1  ;;  %v980_v28 = vpop.f32.mrb[6].mxu0 }
 0x10b   :  { %816 = vst.msk [vmem:[%s1223_s3 + $0x18] sm:$0xff] %vm812_vm1, %v1010_v25  ;;  %v1013_v29 = vadd.f32 %v929_v27, %v26_v10  ;;  %v422_v30 = vpop.f32.mrb[5].mxu1  ;;  %v802_v31 = vpop.f32.mrb[7].mxu0 }
 0x10c   :  { %815 = vst.msk [vmem:[%s1223_s3 + $0x10] sm:$0xff] %vm812_vm1, %v1012_v26  ;;  %v1015_v32 = vadd.f32 %v422_v30, %v26_v10 }
 0x10d   :  { %v1014_v33 = vadd.f32 %v1013_v29, %v977_v20 }
 0x10e   :  { %v1016_v34 = vadd.f32 %v1015_v32, %v790_v23  ;;  %v932_v35 = vpop.f32.mrb[6].mxu1 }
 0x10f   :  { %818 = vst.msk [vmem:[%s1223_s3 + $0x28] sm:$0xff] %vm812_vm1, %v1014_v33  ;;  %v1017_v36 = vadd.f32 %v932_v35, %v26_v10  ;;  %v436_v37 = vpop.f32.mrb[7].mxu1 }
 0x110   :  { %817 = vst.msk [vmem:[%s1223_s3 + $0x20] sm:$0xff] %vm812_vm1, %v1016_v34  ;;  %v1019_v38 = vadd.f32 %v436_v37, %v26_v10 }
 0x111   :  { %v1018_v39 = vadd.f32 %v1017_v36, %v980_v28 }
 0x112   :  { %v1020_v40 = vadd.f32 %v1019_v38, %v802_v31 }
 0x113   :  { %820 = vst.msk [vmem:[%s1223_s3 + $0x38] sm:$0xff] %vm812_vm1, %v1018_v39 }
 0x114   :  { %819 = vst.msk [vmem:[%s1223_s3 + $0x30] sm:$0xff] %vm812_vm1, %v1020_v40 }

</bundles_post_ra>
